<compile_context>
chip_gen: v7x
topology: tpu7x:2x2x1
jax: 0.10.0
libtpu: 0.0.40
codegen_flags: <defaults>
</compile_context>

<pallas_src>
import jax
import jax.numpy as jnp
import numpy as np
from jax import lax
from jax.experimental import pallas as pl
from jax.experimental.pallas import tpu as pltpu


def _round_up(x, m):
    return (x + m - 1) // m * m


def _vmem_capacity_bytes():
    """Per-core VMEM capacity (64 MiB on v7x, 128 MiB on v5e/v6e)."""
    try:
        info = pltpu.get_tpu_info()
        for attr in ("vmem_capacity_bytes", "vmem_size_bytes", "vmem_bytes"):
            v = getattr(info, attr, None)
            if v:
                return int(v)
    except Exception:
        pass
    return 64 << 20  # conservative fallback (v7x per-TC VMEM)


# ----------------------------------------------------------------------------
# Kernel: one T-chunk of the fused fwd+bwd GRU recurrence.
#   len_ref   : [Bp, 1]       int32 sequence lengths
#   xf_ref    : [Tc*Bp, D]    bf16 forward-time chunk of x  (chunk i)
#   xb_ref    : [Tc*Bp, D]    bf16 backward-time chunk of x (chunk n-1-i)
#   wih_*     : [D, 3H] bf16, bgi_* : [1, 3H] f32 (b_ih + folded b_hr/b_hz)
#   wblk_ref  : [2H, 6H] bf16 block-diag hidden weight, bhn_ref: [1, 6H] f32 (b_hn only)
#   outf_ref  : [Tc, Bp, H] f32 fwd outputs, outb_ref: [Tc, Bp, H] f32 bwd outputs
#   hfin_ref  : [Bp, 2H] f32 final hidden (fwd | bwd)
#   hf_scr/hb_scr : [Bp, H] f32 hidden-state carry across grid steps
#   gif_scr/gib_scr : [Tc, Bp, 3H] f32 chunk input gates
# ----------------------------------------------------------------------------
def _bigru_chunk_kernel(len_ref, xf_ref, xb_ref,
                        wih_f_ref, wih_b_ref, bgi_f_ref, bgi_b_ref,
                        wblk_ref, bhn_ref,
                        outf_ref, outb_ref, hfin_ref,
                        hf_scr, hb_scr, gif_scr, gib_scr):
    Tc, Bp, H = outf_ref.shape
    G = 3 * H
    i = pl.program_id(0)
    n = pl.num_programs(0)

    @pl.when(i == 0)
    def _init():
        hf_scr[...] = jnp.zeros_like(hf_scr)
        hb_scr[...] = jnp.zeros_like(hb_scr)

    # Chunk input-gate GEMMs (bf16 operands, f32 accumulate). Time-parallel,
    # off the serial recurrence; results land in VMEM scratch.
    gif = jnp.dot(xf_ref[...], wih_f_ref[...],
                  preferred_element_type=jnp.float32) + bgi_f_ref[...]
    gib = jnp.dot(xb_ref[...], wih_b_ref[...],
                  preferred_element_type=jnp.float32) + bgi_b_ref[...]
    gif_scr[...] = gif.reshape(Tc, Bp, G)
    gib_scr[...] = gib.reshape(Tc, Bp, G)

    lengths = len_ref[...]                       # [Bp, 1] int32
    t0_f = i * Tc                                # global time offset, fwd chunk
    t0_b = (n - 1 - i) * Tc                      # global time offset, bwd chunk

    def cell(gi, gh, h_prev):
        # PyTorch gate order (r, z, n); r/z hidden biases are pre-folded into gi,
        # the n-gate hidden bias is already inside gh (via bhn_ref).
        r = jax.nn.sigmoid(gi[:, 0:H] + gh[:, 0:H])
        z = jax.nn.sigmoid(gi[:, H:2 * H] + gh[:, H:2 * H])
        c = jnp.tanh(gi[:, 2 * H:3 * H] + r * gh[:, 2 * H:3 * H])
        return (1.0 - z) * c + z * h_prev

    def step(t, carry):
        h_f, h_b = carry
        tr = Tc - 1 - t
        gi_f = gif_scr[t]                        # [Bp, 3H]
        gi_b = gib_scr[tr]
        m_f = (t0_f + t < lengths).astype(jnp.float32)    # [Bp, 1]
        m_b = (t0_b + tr < lengths).astype(jnp.float32)
        # One fused MXU push for both directions (block-diagonal hidden weight).
        h_cat = jnp.concatenate([h_f, h_b], axis=-1).astype(wblk_ref.dtype)
        gh = jnp.dot(h_cat, wblk_ref[...],
                     preferred_element_type=jnp.float32) + bhn_ref[...]
        hn_f = cell(gi_f, gh[:, 0:G], h_f)
        hn_b = cell(gi_b, gh[:, G:2 * G], h_b)
        o_f = m_f * hn_f                         # padded steps -> exact zeros
        o_b = m_b * hn_b
        outf_ref[t] = o_f
        outb_ref[tr] = o_b
        return (o_f + (1.0 - m_f) * h_f,         # freeze hidden past the length
                o_b + (1.0 - m_b) * h_b)

    def step2(j, carry):                         # manual 2x unroll: the scheduler
        return step(2 * j + 1, step(2 * j, carry))   # sees 2 steps x 2 directions

    carry = lax.fori_loop(0, Tc // 2, step2, (hf_scr[...], hb_scr[...]))
    if Tc % 2:                                   # static; wrapper keeps Tc even
        carry = step(Tc - 1, carry)
    h_f, h_b = carry

    hf_scr[...] = h_f
    hb_scr[...] = h_b
    hfin_ref[:, 0:H] = h_f
    hfin_ref[:, H:2 * H] = h_b


# ----------------------------------------------------------------------------
# Wrapper mirroring Encoder.forward
# ----------------------------------------------------------------------------
class Encoder:
    """Bidirectional GRU encoder (num_layers=1)."""

    def __init__(self, input_size, hidden_size, num_layers=1, dropout=0.1, key=None):
        # TODO(synk): nn.GRU dropout only applies between stacked layers -> no-op here.
        assert num_layers == 1, "only num_layers=1 supported"
        self.input_size = input_size
        self.hidden_size = hidden_size
        self.num_layers = num_layers

        if key is None:
            key = jax.random.PRNGKey(0)
        k = 1.0 / np.sqrt(hidden_size)
        keys = jax.random.split(key, 8)

        def u(kk, shape):
            return jax.random.uniform(kk, shape, jnp.float32, minval=-k, maxval=k)

        H, D = hidden_size, input_size
        # weights stored transposed for right-multiplication
        self.params = dict(
            wih_f=u(keys[0], (D, 3 * H)), whh_f=u(keys[1], (H, 3 * H)),
            bih_f=u(keys[2], (1, 3 * H)), bhh_f=u(keys[3], (1, 3 * H)),
            wih_b=u(keys[4], (D, 3 * H)), whh_b=u(keys[5], (H, 3 * H)),
            bih_b=u(keys[6], (1, 3 * H)), bhh_b=u(keys[7], (1, 3 * H)),
        )
        p = self.params
        zH = jnp.zeros((1, H), jnp.float32)
        zHH = jnp.zeros((H, 3 * H), jnp.float32)

        # bf16 MXU operands (accumulation stays f32 in-kernel)
        self.wih_f_bf = p["wih_f"].astype(jnp.bfloat16)
        self.wih_b_bf = p["wih_b"].astype(jnp.bfloat16)
        # block-diagonal fused hidden weight: one MXU push per step for both dirs
        self.wblk_bf = jnp.concatenate(
            [jnp.concatenate([p["whh_f"], zHH], axis=1),
             jnp.concatenate([zHH, p["whh_b"]], axis=1)],
            axis=0).astype(jnp.bfloat16)                           # [2H, 6H]
        # fold b_hr/b_hz into the input-gate bias (exact); keep b_hn separate
        self.bgi_f = p["bih_f"] + jnp.concatenate([p["bhh_f"][:, :2 * H], zH], axis=1)
        self.bgi_b = p["bih_b"] + jnp.concatenate([p["bhh_b"][:, :2 * H], zH], axis=1)
        self.bhn = jnp.concatenate(
            [zH, zH, p["bhh_f"][:, 2 * H:], zH, zH, p["bhh_b"][:, 2 * H:]], axis=1)  # [1,6H]

    def __call__(self, x, mask, lengths, time_chunk=None):
        """x: [B, T, D] f32, mask: [B, T] (unused, as in the PyTorch module which
        derives packing from `lengths`), lengths: [B] int."""
        del mask
        B, T, D = x.shape
        H = self.hidden_size
        G = 3 * H
        Bp = max(8, _round_up(B, 8))             # f32 sublane multiple

        # per-generation VMEM budget (~48 MiB on v7x, ~96 MiB on v5e/v6e)
        vmem_cap = _vmem_capacity_bytes()
        vmem_limit = int(min(max(32 << 20, (vmem_cap * 3) // 4), vmem_cap - (2 << 20)))

        if time_chunk is None:
            # per-timestep VMEM cost: double-buffered bf16 x streams + f32 out
            # streams + f32 gi scratch -> pick the largest chunk that fits.
            per_t = Bp * (2 * 2 * D * 2 + 2 * 2 * H * 4 + 2 * 3 * H * 4)
            budget = max(vmem_limit - (8 << 20), 2 << 20)
            tc = int(max(8, min(512, budget // max(per_t, 1))))
            tc -= tc % 8
            time_chunk = min(tc, _round_up(T, 8))
        Tc = max(2, int(time_chunk))
        Tc += Tc % 2                              # even chunk for the 2x-unrolled loop
        Tp = _round_up(T, Tc)
        n_chunks = Tp // Tc

        # pad batch to sublane multiple and time to a chunk multiple; padded
        # rows/steps have mask 0, so they contribute exact zeros.
        lengths = jnp.asarray(lengths, jnp.int32)
        len_col = jnp.pad(lengths, (0, Bp - B)).reshape(Bp, 1)
        xp = jnp.pad(x.astype(jnp.float32), ((0, Bp - B), (0, Tp - T), (0, 0)))
        # time-major bf16 input stream (cast fused into the transpose pass), then
        # flattened so each grid step streams a 2-D [Tc*Bp, D] block.
        x_flat = jnp.transpose(xp, (1, 0, 2)).astype(jnp.bfloat16).reshape(Tp * Bp, D)

        in_specs = [
            pl.BlockSpec((Bp, 1), lambda i: (0, 0)),                        # lengths
            pl.BlockSpec((Tc * Bp, D), lambda i: (i, 0)),                   # x fwd chunk
            pl.BlockSpec((Tc * Bp, D), lambda i: (n_chunks - 1 - i, 0)),    # x bwd chunk
            pl.BlockSpec((D, G), lambda i: (0, 0)),                         # wih_f (resident)
            pl.BlockSpec((D, G), lambda i: (0, 0)),                         # wih_b
            pl.BlockSpec((1, G), lambda i: (0, 0)),                         # bgi_f
            pl.BlockSpec((1, G), lambda i: (0, 0)),                         # bgi_b
            pl.BlockSpec((2 * H, 2 * G), lambda i: (0, 0)),                 # wblk
            pl.BlockSpec((1, 2 * G), lambda i: (0, 0)),                     # bhn
        ]
        out_specs = (
            pl.BlockSpec((Tc, Bp, H), lambda i: (i, 0, 0)),                 # out fwd
            pl.BlockSpec((Tc, Bp, H), lambda i: (n_chunks - 1 - i, 0, 0)),  # out bwd
            pl.BlockSpec((Bp, 2 * H), lambda i: (0, 0)),                    # final hidden
        )
        out_shape = (
            jax.ShapeDtypeStruct((Tp, Bp, H), jnp.float32),
            jax.ShapeDtypeStruct((Tp, Bp, H), jnp.float32),
            jax.ShapeDtypeStruct((Bp, 2 * H), jnp.float32),
        )
        scratch_shapes = [
            pltpu.VMEM((Bp, H), jnp.float32),        # fwd hidden carry
            pltpu.VMEM((Bp, H), jnp.float32),        # bwd hidden carry
            pltpu.VMEM((Tc, Bp, G), jnp.float32),    # fwd chunk input gates
            pltpu.VMEM((Tc, Bp, G), jnp.float32),    # bwd chunk input gates
        ]

        out_f, out_b, hfin = pl.pallas_call(
            _bigru_chunk_kernel,
            grid=(n_chunks,),
            in_specs=in_specs,
            out_specs=out_specs,
            out_shape=out_shape,
            scratch_shapes=scratch_shapes,
            compiler_params=pltpu.CompilerParams(
                dimension_semantics=("arbitrary",),
                vmem_limit_bytes=vmem_limit),
        )(len_col, x_flat, x_flat,
          self.wih_f_bf, self.wih_b_bf, self.bgi_f, self.bgi_b,
          self.wblk_bf, self.bhn)

        # layout plumbing: [Tp,Bp,H] x2 -> [B,T,2H]; XLA fuses concat+transpose+slice.
        output = jnp.concatenate([out_f, out_b], axis=-1)
        output = jnp.transpose(output, (1, 0, 2))[:B, :T]
        final = hfin[:B][None]                                           # [1, B, 2H]
        return output, final


# ----------------------------------------------------------------------------
# Pure-JAX reference mirroring the kernel numerics (bf16 MXU operands, f32
# accumulation / gates / hidden state) and masked-pack semantics.
# ----------------------------------------------------------------------------
def encoder_reference(x, lengths, params, hidden_size):
    B, T, _ = x.shape
    H = hidden_size

    def mm(a, b):
        return jnp.dot(a.astype(jnp.bfloat16), b.astype(jnp.bfloat16),
                       preferred_element_type=jnp.float32)

    mask = (jnp.arange(T)[None, :] < lengths[:, None]).astype(jnp.float32)

    def run(reverse, wih, whh, bih, bhh):
        h = jnp.zeros((B, H), jnp.float32)
        outs = [None] * T
        order = range(T - 1, -1, -1) if reverse else range(T)
        for t in order:
            m = mask[:, t:t + 1]
            gi = mm(x[:, t], wih) + bih
            gh = mm(h, whh) + bhh
            r = jax.nn.sigmoid(gi[:, :H] + gh[:, :H])
            z = jax.nn.sigmoid(gi[:, H:2 * H] + gh[:, H:2 * H])
            c = jnp.tanh(gi[:, 2 * H:] + r * gh[:, 2 * H:])
            hn = (1.0 - z) * c + z * h
            outs[t] = m * hn
            h = m * hn + (1.0 - m) * h
        return jnp.stack(outs, 1), h

    out_f, hf = run(False, params["wih_f"], params["whh_f"],
                    params["bih_f"], params["bhh_f"])
    out_b, hb = run(True, params["wih_b"], params["whh_b"],
                    params["bih_b"], params["bhh_b"])
    output = jnp.concatenate([out_f, out_b], axis=-1)
    final = jnp.concatenate([hf, hb], axis=-1)[None]
    return output, final


if __name__ == "__main__":
    # Case 1: small module-consistent shapes (batch=2, seq=8, dim=16, hidden=32).
    B, T, D, H = 2, 8, 16, 32
    key = jax.random.PRNGKey(0)
    kx, kw, kx2 = jax.random.split(key, 3)
    x = jax.random.normal(kx, (B, T, D), jnp.float32)
    lengths = jnp.array([8, 5], dtype=jnp.int32)          # sorted descending (pack convention)
    mask = (jnp.arange(T)[None, :] < lengths[:, None]).astype(jnp.float32)

    enc = Encoder(input_size=D, hidden_size=H, num_layers=1, dropout=0.1, key=kw)
    ref_out, ref_final = encoder_reference(x, lengths, enc.params, H)

    # auto chunk (single T-chunk at this size)
    out, fin = jax.block_until_ready(enc(x, mask, lengths))
    np.testing.assert_allclose(np.asarray(out), np.asarray(ref_out), rtol=1e-4, atol=1e-4)
    np.testing.assert_allclose(np.asarray(fin), np.asarray(ref_final), rtol=1e-4, atol=1e-4)
    assert out.shape == (B, T, 2 * H) and fin.shape == (1, B, 2 * H)

    # multi-chunk grid path (T streamed in chunks of 4 -> exercises the VMEM-carried
    # hidden state across grid steps)
    out2, fin2 = jax.block_until_ready(enc(x, mask, lengths, time_chunk=4))
    np.testing.assert_allclose(np.asarray(out2), np.asarray(ref_out), rtol=1e-4, atol=1e-4)
    np.testing.assert_allclose(np.asarray(fin2), np.asarray(ref_final), rtol=1e-4, atol=1e-4)

    # Case 2: longer non-multiple T with batch padding (B=3 -> Bp=8, T=20 -> Tp=24).
    B2, T2 = 3, 20
    x2 = jax.random.normal(kx2, (B2, T2, D), jnp.float32)
    lengths2 = jnp.array([20, 13, 7], dtype=jnp.int32)
    mask2 = (jnp.arange(T2)[None, :] < lengths2[:, None]).astype(jnp.float32)
    ref_out2, ref_final2 = encoder_reference(x2, lengths2, enc.params, H)
    out3, fin3 = jax.block_until_ready(enc(x2, mask2, lengths2, time_chunk=8))
    np.testing.assert_allclose(np.asarray(out3), np.asarray(ref_out2), rtol=1e-4, atol=1e-4)
    np.testing.assert_allclose(np.asarray(fin3), np.asarray(ref_final2), rtol=1e-4, atol=1e-4)
    assert out3.shape == (B2, T2, 2 * H) and fin3.shape == (1, B2, 2 * H)

    print("KERNEL_OK")
</pallas_src>

<mosaic_0001>
module attributes {stable_mosaic.version = 11 : i64} {
  func.func @_bigru_chunk_kernel(%arg0: i32, %arg1: memref<8x1xi32, #tpu.memory_space<vmem>>, %arg2: memref<64x16xbf16, #tpu.memory_space<vmem>>, %arg3: memref<64x16xbf16, #tpu.memory_space<vmem>>, %arg4: memref<16x96xbf16, #tpu.memory_space<vmem>>, %arg5: memref<16x96xbf16, #tpu.memory_space<vmem>>, %arg6: memref<1x96xf32, #tpu.memory_space<vmem>>, %arg7: memref<1x96xf32, #tpu.memory_space<vmem>>, %arg8: memref<64x192xbf16, #tpu.memory_space<vmem>>, %arg9: memref<1x192xf32, #tpu.memory_space<vmem>>, %arg10: memref<8x8x32xf32, #tpu.memory_space<vmem>>, %arg11: memref<8x8x32xf32, #tpu.memory_space<vmem>>, %arg12: memref<8x64xf32, #tpu.memory_space<vmem>>, %arg13: memref<8x32xf32, #tpu.memory_space<vmem>>, %arg14: memref<8x32xf32, #tpu.memory_space<vmem>>, %arg15: memref<8x8x96xf32, #tpu.memory_space<vmem>>, %arg16: memref<8x8x96xf32, #tpu.memory_space<vmem>>) attributes {dimension_semantics = [#tpu.dimension_semantics<arbitrary>], iteration_bounds = array<i64: 1>, scalar_prefetch = 0 : i64, scratch_operands = 4 : i64, tpu.core_type = #tpu.core_type<tc>, window_params = [{pipeline_mode = #tpu.pipeline_mode<synchronous>, transform_indices = @transform_0, window_bounds = array<i64: 8, 1>}, {transform_indices = @transform_1, window_bounds = array<i64: 64, 16>}, {transform_indices = @transform_2, window_bounds = array<i64: 64, 16>}, {pipeline_mode = #tpu.pipeline_mode<synchronous>, transform_indices = @transform_3, window_bounds = array<i64: 16, 96>}, {pipeline_mode = #tpu.pipeline_mode<synchronous>, transform_indices = @transform_4, window_bounds = array<i64: 16, 96>}, {pipeline_mode = #tpu.pipeline_mode<synchronous>, transform_indices = @transform_5, window_bounds = array<i64: 1, 96>}, {pipeline_mode = #tpu.pipeline_mode<synchronous>, transform_indices = @transform_6, window_bounds = array<i64: 1, 96>}, {pipeline_mode = #tpu.pipeline_mode<synchronous>, transform_indices = @transform_7, window_bounds = array<i64: 64, 192>}, {pipeline_mode = #tpu.pipeline_mode<synchronous>, transform_indices = @transform_8, window_bounds = array<i64: 1, 192>}, {transform_indices = @transform_9, window_bounds = array<i64: 8, 8, 32>}, {transform_indices = @transform_10, window_bounds = array<i64: 8, 8, 32>}, {pipeline_mode = #tpu.pipeline_mode<synchronous>, transform_indices = @transform_11, window_bounds = array<i64: 8, 64>}]} {
    %c0_i32 = arith.constant 0 : i32
    %0 = arith.cmpi eq, %arg0, %c0_i32 : i32
    %1 = arith.extui %0 : i1 to i32
    %c0_i32_0 = arith.constant 0 : i32
    %2 = arith.cmpi ne, %1, %c0_i32_0 : i32
    scf.if %2 {
      %cst_36 = arith.constant 0.000000e+00 : f32
      %31 = vector.broadcast %cst_36 : f32 to vector<8x32xf32>
      %c0_37 = arith.constant 0 : index
      %c0_38 = arith.constant 0 : index
      %32 = vector.load %arg13[%c0_37, %c0_38] : memref<8x32xf32, #tpu.memory_space<vmem>>, vector<8x32xf32>
      tpu.vector_store %arg13[%c0_37, %c0_38], %31 {strides = array<i32>} : memref<8x32xf32, #tpu.memory_space<vmem>>, vector<8x32xf32>,
      %cst_39 = arith.constant 0.000000e+00 : f32
      %33 = vector.broadcast %cst_39 : f32 to vector<8x32xf32>
      %c0_40 = arith.constant 0 : index
      %c0_41 = arith.constant 0 : index
      %34 = vector.load %arg14[%c0_40, %c0_41] : memref<8x32xf32, #tpu.memory_space<vmem>>, vector<8x32xf32>
      tpu.vector_store %arg14[%c0_40, %c0_41], %33 {strides = array<i32>} : memref<8x32xf32, #tpu.memory_space<vmem>>, vector<8x32xf32>,
    } else {
    }
    %c0 = arith.constant 0 : index
    %c0_1 = arith.constant 0 : index
    %3 = vector.load %arg2[%c0, %c0_1] : memref<64x16xbf16, #tpu.memory_space<vmem>>, vector<64x16xbf16>
    %c0_2 = arith.constant 0 : index
    %c0_3 = arith.constant 0 : index
    %4 = vector.load %arg4[%c0_2, %c0_3] : memref<16x96xbf16, #tpu.memory_space<vmem>>, vector<16x96xbf16>
    %cst = arith.constant dense<0.000000e+00> : vector<64x96xf32>
    %5 = tpu.matmul %3, %4, %cst {dimension_numbers = #tpu.dot_dimension_numbers<[1], [0], [0], [1], [0, 0, 1, 1], [], []>} : vector<64x16xbf16>, vector<16x96xbf16>, vector<64x96xf32> -> vector<64x96xf32>
    %c0_4 = arith.constant 0 : index
    %c0_5 = arith.constant 0 : index
    %6 = vector.load %arg6[%c0_4, %c0_5] : memref<1x96xf32, #tpu.memory_space<vmem>>, vector<1x96xf32>
    %7 = vector.broadcast %6 : vector<1x96xf32> to vector<64x96xf32>
    %8 = arith.addf %5, %7 : vector<64x96xf32>
    %c0_6 = arith.constant 0 : index
    %c0_7 = arith.constant 0 : index
    %9 = vector.load %arg3[%c0_6, %c0_7] : memref<64x16xbf16, #tpu.memory_space<vmem>>, vector<64x16xbf16>
    %c0_8 = arith.constant 0 : index
    %c0_9 = arith.constant 0 : index
    %10 = vector.load %arg5[%c0_8, %c0_9] : memref<16x96xbf16, #tpu.memory_space<vmem>>, vector<16x96xbf16>
    %cst_10 = arith.constant dense<0.000000e+00> : vector<64x96xf32>
    %11 = tpu.matmul %9, %10, %cst_10 {dimension_numbers = #tpu.dot_dimension_numbers<[1], [0], [0], [1], [0, 0, 1, 1], [], []>} : vector<64x16xbf16>, vector<16x96xbf16>, vector<64x96xf32> -> vector<64x96xf32>
    %c0_11 = arith.constant 0 : index
    %c0_12 = arith.constant 0 : index
    %12 = vector.load %arg7[%c0_11, %c0_12] : memref<1x96xf32, #tpu.memory_space<vmem>>, vector<1x96xf32>
    %13 = vector.broadcast %12 : vector<1x96xf32> to vector<64x96xf32>
    %14 = arith.addf %11, %13 : vector<64x96xf32>
    %15 = vector.shape_cast %8 : vector<64x96xf32> to vector<8x8x96xf32>
    %c0_13 = arith.constant 0 : index
    %c0_14 = arith.constant 0 : index
    %c0_15 = arith.constant 0 : index
    %16 = vector.load %arg15[%c0_13, %c0_14, %c0_15] : memref<8x8x96xf32, #tpu.memory_space<vmem>>, vector<8x8x96xf32>
    tpu.vector_store %arg15[%c0_13, %c0_14, %c0_15], %15 {strides = array<i32>} : memref<8x8x96xf32, #tpu.memory_space<vmem>>, vector<8x8x96xf32>,
    %17 = vector.shape_cast %14 : vector<64x96xf32> to vector<8x8x96xf32>
    %c0_16 = arith.constant 0 : index
    %c0_17 = arith.constant 0 : index
    %c0_18 = arith.constant 0 : index
    %18 = vector.load %arg16[%c0_16, %c0_17, %c0_18] : memref<8x8x96xf32, #tpu.memory_space<vmem>>, vector<8x8x96xf32>
    tpu.vector_store %arg16[%c0_16, %c0_17, %c0_18], %17 {strides = array<i32>} : memref<8x8x96xf32, #tpu.memory_space<vmem>>, vector<8x8x96xf32>,
    %c0_19 = arith.constant 0 : index
    %c0_20 = arith.constant 0 : index
    %19 = vector.load %arg1[%c0_19, %c0_20] : memref<8x1xi32, #tpu.memory_space<vmem>>, vector<8x1xi32>
    %c8_i32 = arith.constant 8 : i32
    %20 = arith.muli %arg0, %c8_i32 : i32
    %c0_i32_21 = arith.constant 0 : i32
    %21 = arith.subi %c0_i32_21, %arg0 : i32
    %c8_i32_22 = arith.constant 8 : i32
    %22 = arith.muli %21, %c8_i32_22 : i32
    %c0_23 = arith.constant 0 : index
    %c0_24 = arith.constant 0 : index
    %23 = vector.load %arg13[%c0_23, %c0_24] : memref<8x32xf32, #tpu.memory_space<vmem>>, vector<8x32xf32>
    %c0_25 = arith.constant 0 : index
    %c0_26 = arith.constant 0 : index
    %24 = vector.load %arg14[%c0_25, %c0_26] : memref<8x32xf32, #tpu.memory_space<vmem>>, vector<8x32xf32>
    %c0_i32_27 = arith.constant 0 : i32
    %c4_i32 = arith.constant 4 : i32
    %25 = arith.addi %c0_i32_27, %c4_i32 : i32
    %c1_i32 = arith.constant 1 : i32
    %26:2 = scf.for %arg17 = %c0_i32_27 to %25 step %c1_i32 iter_args(%arg18 = %23, %arg19 = %24) -> (vector<8x32xf32>, vector<8x32xf32>)  : i32 {
      %c2_i32 = arith.constant 2 : i32
      %31 = arith.muli %c2_i32, %arg17 : i32
      %c1_i32_36 = arith.constant 1 : i32
      %32 = arith.addi %31, %c1_i32_36 : i32
      %c2_i32_37 = arith.constant 2 : i32
      %33 = arith.muli %c2_i32_37, %arg17 : i32
      %c7_i32 = arith.constant 7 : i32
      %34 = arith.subi %c7_i32, %33 : i32
      %35 = arith.index_cast %33 : i32 to index
      %c0_38 = arith.constant 0 : index
      %c0_39 = arith.constant 0 : index
      %36 = vector.load %arg15[%35, %c0_38, %c0_39] : memref<8x8x96xf32, #tpu.memory_space<vmem>>, vector<1x8x96xf32>
      %37 = vector.shape_cast %36 : vector<1x8x96xf32> to vector<8x96xf32>
      %38 = arith.index_cast %34 : i32 to index
      %c0_40 = arith.constant 0 : index
      %c0_41 = arith.constant 0 : index
      %39 = vector.load %arg16[%38, %c0_40, %c0_41] : memref<8x8x96xf32, #tpu.memory_space<vmem>>, vector<1x8x96xf32>
      %40 = vector.shape_cast %39 : vector<1x8x96xf32> to vector<8x96xf32>
      %41 = arith.addi %20, %33 : i32
      %42 = vector.broadcast %41 : i32 to vector<8x1xi32>
      %43 = arith.cmpi slt, %42, %19 : vector<8x1xi32>
      %44 = arith.extui %43 : vector<8x1xi1> to vector<8x1xi32>
      %45 = arith.sitofp %44 : vector<8x1xi32> to vector<8x1xf32>
      %46 = arith.addi %22, %34 : i32
      %47 = vector.broadcast %46 : i32 to vector<8x1xi32>
      %48 = arith.cmpi slt, %47, %19 : vector<8x1xi32>
      %49 = arith.extui %48 : vector<8x1xi1> to vector<8x1xi32>
      %50 = arith.sitofp %49 : vector<8x1xi32> to vector<8x1xf32>
      %51 = tpu.concatenate %arg18, %arg19 in 1 : vector<8x32xf32>, vector<8x32xf32> -> vector<8x64xf32>
      %52 = arith.truncf %51 : vector<8x64xf32> to vector<8x64xbf16>
      %c0_42 = arith.constant 0 : index
      %c0_43 = arith.constant 0 : index
      %53 = vector.load %arg8[%c0_42, %c0_43] : memref<64x192xbf16, #tpu.memory_space<vmem>>, vector<64x192xbf16>
      %cst_44 = arith.constant dense<0.000000e+00> : vector<8x192xf32>
      %54 = tpu.matmul %52, %53, %cst_44 {dimension_numbers = #tpu.dot_dimension_numbers<[1], [0], [0], [1], [0, 0, 1, 1], [], []>} : vector<8x64xbf16>, vector<64x192xbf16>, vector<8x192xf32> -> vector<8x192xf32>
      %c0_45 = arith.constant 0 : index
      %c0_46 = arith.constant 0 : index
      %55 = vector.load %arg9[%c0_45, %c0_46] : memref<1x192xf32, #tpu.memory_space<vmem>>, vector<1x192xf32>
      %56 = vector.broadcast %55 : vector<1x192xf32> to vector<8x192xf32>
      %57 = arith.addf %54, %56 : vector<8x192xf32>
      %58 = vector.extract_strided_slice %57 {offsets = [0, 0], sizes = [8, 96], strides = [1, 1]} : vector<8x192xf32> to vector<8x96xf32>
      %59 = vector.extract_strided_slice %37 {offsets = [0, 0], sizes = [8, 32], strides = [1, 1]} : vector<8x96xf32> to vector<8x32xf32>
      %60 = vector.extract_strided_slice %58 {offsets = [0, 0], sizes = [8, 32], strides = [1, 1]} : vector<8x96xf32> to vector<8x32xf32>
      %61 = arith.addf %59, %60 : vector<8x32xf32>
      %62 = arith.negf %61 : vector<8x32xf32>
      %63 = math.exp %62 : vector<8x32xf32>
      %cst_47 = arith.constant 1.000000e+00 : f32
      %64 = vector.broadcast %cst_47 : f32 to vector<8x32xf32>
      %65 = arith.addf %64, %63 : vector<8x32xf32>
      %66 = arith.divf %64, %65 : vector<8x32xf32>
      %67 = vector.extract_strided_slice %37 {offsets = [0, 32], sizes = [8, 32], strides = [1, 1]} : vector<8x96xf32> to vector<8x32xf32>
      %68 = vector.extract_strided_slice %58 {offsets = [0, 32], sizes = [8, 32], strides = [1, 1]} : vector<8x96xf32> to vector<8x32xf32>
      %69 = arith.addf %67, %68 : vector<8x32xf32>
      %70 = arith.negf %69 : vector<8x32xf32>
      %71 = math.exp %70 : vector<8x32xf32>
      %cst_48 = arith.constant 1.000000e+00 : f32
      %72 = vector.broadcast %cst_48 : f32 to vector<8x32xf32>
      %73 = arith.addf %72, %71 : vector<8x32xf32>
      %74 = arith.divf %72, %73 : vector<8x32xf32>
      %75 = vector.extract_strided_slice %37 {offsets = [0, 64], sizes = [8, 32], strides = [1, 1]} : vector<8x96xf32> to vector<8x32xf32>
      %76 = vector.extract_strided_slice %58 {offsets = [0, 64], sizes = [8, 32], strides = [1, 1]} : vector<8x96xf32> to vector<8x32xf32>
      %77 = arith.mulf %66, %76 : vector<8x32xf32>
      %78 = arith.addf %75, %77 : vector<8x32xf32>
      %79 = math.tanh %78 : vector<8x32xf32>
      %cst_49 = arith.constant 1.000000e+00 : f32
      %80 = vector.broadcast %cst_49 : f32 to vector<8x32xf32>
      %81 = arith.subf %80, %74 : vector<8x32xf32>
      %82 = arith.mulf %81, %79 : vector<8x32xf32>
      %83 = arith.mulf %74, %arg18 : vector<8x32xf32>
      %84 = arith.addf %82, %83 : vector<8x32xf32>
      %85 = vector.extract_strided_slice %57 {offsets = [0, 96], sizes = [8, 96], strides = [1, 1]} : vector<8x192xf32> to vector<8x96xf32>
      %86 = vector.extract_strided_slice %40 {offsets = [0, 0], sizes = [8, 32], strides = [1, 1]} : vector<8x96xf32> to vector<8x32xf32>
      %87 = vector.extract_strided_slice %85 {offsets = [0, 0], sizes = [8, 32], strides = [1, 1]} : vector<8x96xf32> to vector<8x32xf32>
      %88 = arith.addf %86, %87 : vector<8x32xf32>
      %89 = arith.negf %88 : vector<8x32xf32>
      %90 = math.exp %89 : vector<8x32xf32>
      %cst_50 = arith.constant 1.000000e+00 : f32
      %91 = vector.broadcast %cst_50 : f32 to vector<8x32xf32>
      %92 = arith.addf %91, %90 : vector<8x32xf32>
      %93 = arith.divf %91, %92 : vector<8x32xf32>
      %94 = vector.extract_strided_slice %40 {offsets = [0, 32], sizes = [8, 32], strides = [1, 1]} : vector<8x96xf32> to vector<8x32xf32>
      %95 = vector.extract_strided_slice %85 {offsets = [0, 32], sizes = [8, 32], strides = [1, 1]} : vector<8x96xf32> to vector<8x32xf32>
      %96 = arith.addf %94, %95 : vector<8x32xf32>
      %97 = arith.negf %96 : vector<8x32xf32>
      %98 = math.exp %97 : vector<8x32xf32>
      %cst_51 = arith.constant 1.000000e+00 : f32
      %99 = vector.broadcast %cst_51 : f32 to vector<8x32xf32>
      %100 = arith.addf %99, %98 : vector<8x32xf32>
      %101 = arith.divf %99, %100 : vector<8x32xf32>
      %102 = vector.extract_strided_slice %40 {offsets = [0, 64], sizes = [8, 32], strides = [1, 1]} : vector<8x96xf32> to vector<8x32xf32>
      %103 = vector.extract_strided_slice %85 {offsets = [0, 64], sizes = [8, 32], strides = [1, 1]} : vector<8x96xf32> to vector<8x32xf32>
      %104 = arith.mulf %93, %103 : vector<8x32xf32>
      %105 = arith.addf %102, %104 : vector<8x32xf32>
      %106 = math.tanh %105 : vector<8x32xf32>
      %cst_52 = arith.constant 1.000000e+00 : f32
      %107 = vector.broadcast %cst_52 : f32 to vector<8x32xf32>
      %108 = arith.subf %107, %101 : vector<8x32xf32>
      %109 = arith.mulf %108, %106 : vector<8x32xf32>
      %110 = arith.mulf %101, %arg19 : vector<8x32xf32>
      %111 = arith.addf %109, %110 : vector<8x32xf32>
      %112 = vector.broadcast %45 : vector<8x1xf32> to vector<8x32xf32>
      %113 = arith.mulf %112, %84 : vector<8x32xf32>
      %114 = vector.broadcast %50 : vector<8x1xf32> to vector<8x32xf32>
      %115 = arith.mulf %114, %111 : vector<8x32xf32>
      %116 = arith.index_cast %33 : i32 to index
      %c0_53 = arith.constant 0 : index
      %c0_54 = arith.constant 0 : index
      %117 = vector.load %arg10[%116, %c0_53, %c0_54] : memref<8x8x32xf32, #tpu.memory_space<vmem>>, vector<1x8x32xf32>
      %118 = vector.shape_cast %117 : vector<1x8x32xf32> to vector<8x32xf32>
      %119 = vector.shape_cast %113 : vector<8x32xf32> to vector<1x8x32xf32>
      tpu.vector_store %arg10[%116, %c0_53, %c0_54], %119 {strides = array<i32>} : memref<8x8x32xf32, #tpu.memory_space<vmem>>, vector<1x8x32xf32>,
      %120 = arith.index_cast %34 : i32 to index
      %c0_55 = arith.constant 0 : index
      %c0_56 = arith.constant 0 : index
      %121 = vector.load %arg11[%120, %c0_55, %c0_56] : memref<8x8x32xf32, #tpu.memory_space<vmem>>, vector<1x8x32xf32>
      %122 = vector.shape_cast %121 : vector<1x8x32xf32> to vector<8x32xf32>
      %123 = vector.shape_cast %115 : vector<8x32xf32> to vector<1x8x32xf32>
      tpu.vector_store %arg11[%120, %c0_55, %c0_56], %123 {strides = array<i32>} : memref<8x8x32xf32, #tpu.memory_space<vmem>>, vector<1x8x32xf32>,
      %cst_57 = arith.constant 1.000000e+00 : f32
      %124 = vector.broadcast %cst_57 : f32 to vector<8x1xf32>
      %125 = arith.subf %124, %45 : vector<8x1xf32>
      %126 = vector.broadcast %125 : vector<8x1xf32> to vector<8x32xf32>
      %127 = arith.mulf %126, %arg18 : vector<8x32xf32>
      %128 = arith.addf %113, %127 : vector<8x32xf32>
      %cst_58 = arith.constant 1.000000e+00 : f32
      %129 = vector.broadcast %cst_58 : f32 to vector<8x1xf32>
      %130 = arith.subf %129, %50 : vector<8x1xf32>
      %131 = vector.broadcast %130 : vector<8x1xf32> to vector<8x32xf32>
      %132 = arith.mulf %131, %arg19 : vector<8x32xf32>
      %133 = arith.addf %115, %132 : vector<8x32xf32>
      %c7_i32_59 = arith.constant 7 : i32
      %134 = arith.subi %c7_i32_59, %32 : i32
      %135 = arith.index_cast %32 : i32 to index
      %c0_60 = arith.constant 0 : index
      %c0_61 = arith.constant 0 : index
      %136 = vector.load %arg15[%135, %c0_60, %c0_61] : memref<8x8x96xf32, #tpu.memory_space<vmem>>, vector<1x8x96xf32>
      %137 = vector.shape_cast %136 : vector<1x8x96xf32> to vector<8x96xf32>
      %138 = arith.index_cast %134 : i32 to index
      %c0_62 = arith.constant 0 : index
      %c0_63 = arith.constant 0 : index
      %139 = vector.load %arg16[%138, %c0_62, %c0_63] : memref<8x8x96xf32, #tpu.memory_space<vmem>>, vector<1x8x96xf32>
      %140 = vector.shape_cast %139 : vector<1x8x96xf32> to vector<8x96xf32>
      %141 = arith.addi %20, %32 : i32
      %142 = vector.broadcast %141 : i32 to vector<8x1xi32>
      %143 = arith.cmpi slt, %142, %19 : vector<8x1xi32>
      %144 = arith.extui %143 : vector<8x1xi1> to vector<8x1xi32>
      %145 = arith.sitofp %144 : vector<8x1xi32> to vector<8x1xf32>
      %146 = arith.addi %22, %134 : i32
      %147 = vector.broadcast %146 : i32 to vector<8x1xi32>
      %148 = arith.cmpi slt, %147, %19 : vector<8x1xi32>
      %149 = arith.extui %148 : vector<8x1xi1> to vector<8x1xi32>
      %150 = arith.sitofp %149 : vector<8x1xi32> to vector<8x1xf32>
      %151 = tpu.concatenate %128, %133 in 1 : vector<8x32xf32>, vector<8x32xf32> -> vector<8x64xf32>
      %152 = arith.truncf %151 : vector<8x64xf32> to vector<8x64xbf16>
      %c0_64 = arith.constant 0 : index
      %c0_65 = arith.constant 0 : index
      %153 = vector.load %arg8[%c0_64, %c0_65] : memref<64x192xbf16, #tpu.memory_space<vmem>>, vector<64x192xbf16>
      %cst_66 = arith.constant dense<0.000000e+00> : vector<8x192xf32>
      %154 = tpu.matmul %152, %153, %cst_66 {dimension_numbers = #tpu.dot_dimension_numbers<[1], [0], [0], [1], [0, 0, 1, 1], [], []>} : vector<8x64xbf16>, vector<64x192xbf16>, vector<8x192xf32> -> vector<8x192xf32>
      %c0_67 = arith.constant 0 : index
      %c0_68 = arith.constant 0 : index
      %155 = vector.load %arg9[%c0_67, %c0_68] : memref<1x192xf32, #tpu.memory_space<vmem>>, vector<1x192xf32>
      %156 = vector.broadcast %155 : vector<1x192xf32> to vector<8x192xf32>
      %157 = arith.addf %154, %156 : vector<8x192xf32>
      %158 = vector.extract_strided_slice %157 {offsets = [0, 0], sizes = [8, 96], strides = [1, 1]} : vector<8x192xf32> to vector<8x96xf32>
      %159 = vector.extract_strided_slice %137 {offsets = [0, 0], sizes = [8, 32], strides = [1, 1]} : vector<8x96xf32> to vector<8x32xf32>
      %160 = vector.extract_strided_slice %158 {offsets = [0, 0], sizes = [8, 32], strides = [1, 1]} : vector<8x96xf32> to vector<8x32xf32>
      %161 = arith.addf %159, %160 : vector<8x32xf32>
      %162 = arith.negf %161 : vector<8x32xf32>
      %163 = math.exp %162 : vector<8x32xf32>
      %cst_69 = arith.constant 1.000000e+00 : f32
      %164 = vector.broadcast %cst_69 : f32 to vector<8x32xf32>
      %165 = arith.addf %164, %163 : vector<8x32xf32>
      %166 = arith.divf %164, %165 : vector<8x32xf32>
      %167 = vector.extract_strided_slice %137 {offsets = [0, 32], sizes = [8, 32], strides = [1, 1]} : vector<8x96xf32> to vector<8x32xf32>
      %168 = vector.extract_strided_slice %158 {offsets = [0, 32], sizes = [8, 32], strides = [1, 1]} : vector<8x96xf32> to vector<8x32xf32>
      %169 = arith.addf %167, %168 : vector<8x32xf32>
      %170 = arith.negf %169 : vector<8x32xf32>
      %171 = math.exp %170 : vector<8x32xf32>
      %cst_70 = arith.constant 1.000000e+00 : f32
      %172 = vector.broadcast %cst_70 : f32 to vector<8x32xf32>
      %173 = arith.addf %172, %171 : vector<8x32xf32>
      %174 = arith.divf %172, %173 : vector<8x32xf32>
      %175 = vector.extract_strided_slice %137 {offsets = [0, 64], sizes = [8, 32], strides = [1, 1]} : vector<8x96xf32> to vector<8x32xf32>
      %176 = vector.extract_strided_slice %158 {offsets = [0, 64], sizes = [8, 32], strides = [1, 1]} : vector<8x96xf32> to vector<8x32xf32>
      %177 = arith.mulf %166, %176 : vector<8x32xf32>
      %178 = arith.addf %175, %177 : vector<8x32xf32>
      %179 = math.tanh %178 : vector<8x32xf32>
      %cst_71 = arith.constant 1.000000e+00 : f32
      %180 = vector.broadcast %cst_71 : f32 to vector<8x32xf32>
      %181 = arith.subf %180, %174 : vector<8x32xf32>
      %182 = arith.mulf %181, %179 : vector<8x32xf32>
      %183 = arith.mulf %174, %128 : vector<8x32xf32>
      %184 = arith.addf %182, %183 : vector<8x32xf32>
      %185 = vector.extract_strided_slice %157 {offsets = [0, 96], sizes = [8, 96], strides = [1, 1]} : vector<8x192xf32> to vector<8x96xf32>
      %186 = vector.extract_strided_slice %140 {offsets = [0, 0], sizes = [8, 32], strides = [1, 1]} : vector<8x96xf32> to vector<8x32xf32>
      %187 = vector.extract_strided_slice %185 {offsets = [0, 0], sizes = [8, 32], strides = [1, 1]} : vector<8x96xf32> to vector<8x32xf32>
      %188 = arith.addf %186, %187 : vector<8x32xf32>
      %189 = arith.negf %188 : vector<8x32xf32>
      %190 = math.exp %189 : vector<8x32xf32>
      %cst_72 = arith.constant 1.000000e+00 : f32
      %191 = vector.broadcast %cst_72 : f32 to vector<8x32xf32>
      %192 = arith.addf %191, %190 : vector<8x32xf32>
      %193 = arith.divf %191, %192 : vector<8x32xf32>
      %194 = vector.extract_strided_slice %140 {offsets = [0, 32], sizes = [8, 32], strides = [1, 1]} : vector<8x96xf32> to vector<8x32xf32>
      %195 = vector.extract_strided_slice %185 {offsets = [0, 32], sizes = [8, 32], strides = [1, 1]} : vector<8x96xf32> to vector<8x32xf32>
      %196 = arith.addf %194, %195 : vector<8x32xf32>
      %197 = arith.negf %196 : vector<8x32xf32>
      %198 = math.exp %197 : vector<8x32xf32>
      %cst_73 = arith.constant 1.000000e+00 : f32
      %199 = vector.broadcast %cst_73 : f32 to vector<8x32xf32>
      %200 = arith.addf %199, %198 : vector<8x32xf32>
      %201 = arith.divf %199, %200 : vector<8x32xf32>
      %202 = vector.extract_strided_slice %140 {offsets = [0, 64], sizes = [8, 32], strides = [1, 1]} : vector<8x96xf32> to vector<8x32xf32>
      %203 = vector.extract_strided_slice %185 {offsets = [0, 64], sizes = [8, 32], strides = [1, 1]} : vector<8x96xf32> to vector<8x32xf32>
      %204 = arith.mulf %193, %203 : vector<8x32xf32>
      %205 = arith.addf %202, %204 : vector<8x32xf32>
      %206 = math.tanh %205 : vector<8x32xf32>
      %cst_74 = arith.constant 1.000000e+00 : f32
      %207 = vector.broadcast %cst_74 : f32 to vector<8x32xf32>
      %208 = arith.subf %207, %201 : vector<8x32xf32>
      %209 = arith.mulf %208, %206 : vector<8x32xf32>
      %210 = arith.mulf %201, %133 : vector<8x32xf32>
      %211 = arith.addf %209, %210 : vector<8x32xf32>
      %212 = vector.broadcast %145 : vector<8x1xf32> to vector<8x32xf32>
      %213 = arith.mulf %212, %184 : vector<8x32xf32>
      %214 = vector.broadcast %150 : vector<8x1xf32> to vector<8x32xf32>
      %215 = arith.mulf %214, %211 : vector<8x32xf32>
      %216 = arith.index_cast %32 : i32 to index
      %c0_75 = arith.constant 0 : index
      %c0_76 = arith.constant 0 : index
      %217 = vector.load %arg10[%216, %c0_75, %c0_76] : memref<8x8x32xf32, #tpu.memory_space<vmem>>, vector<1x8x32xf32>
      %218 = vector.shape_cast %217 : vector<1x8x32xf32> to vector<8x32xf32>
      %219 = vector.shape_cast %213 : vector<8x32xf32> to vector<1x8x32xf32>
      tpu.vector_store %arg10[%216, %c0_75, %c0_76], %219 {strides = array<i32>} : memref<8x8x32xf32, #tpu.memory_space<vmem>>, vector<1x8x32xf32>,
      %220 = arith.index_cast %134 : i32 to index
      %c0_77 = arith.constant 0 : index
      %c0_78 = arith.constant 0 : index
      %221 = vector.load %arg11[%220, %c0_77, %c0_78] : memref<8x8x32xf32, #tpu.memory_space<vmem>>, vector<1x8x32xf32>
      %222 = vector.shape_cast %221 : vector<1x8x32xf32> to vector<8x32xf32>
      %223 = vector.shape_cast %215 : vector<8x32xf32> to vector<1x8x32xf32>
      tpu.vector_store %arg11[%220, %c0_77, %c0_78], %223 {strides = array<i32>} : memref<8x8x32xf32, #tpu.memory_space<vmem>>, vector<1x8x32xf32>,
      %cst_79 = arith.constant 1.000000e+00 : f32
      %224 = vector.broadcast %cst_79 : f32 to vector<8x1xf32>
      %225 = arith.subf %224, %145 : vector<8x1xf32>
      %226 = vector.broadcast %225 : vector<8x1xf32> to vector<8x32xf32>
      %227 = arith.mulf %226, %128 : vector<8x32xf32>
      %228 = arith.addf %213, %227 : vector<8x32xf32>
      %cst_80 = arith.constant 1.000000e+00 : f32
      %229 = vector.broadcast %cst_80 : f32 to vector<8x1xf32>
      %230 = arith.subf %229, %150 : vector<8x1xf32>
      %231 = vector.broadcast %230 : vector<8x1xf32> to vector<8x32xf32>
      %232 = arith.mulf %231, %133 : vector<8x32xf32>
      %233 = arith.addf %215, %232 : vector<8x32xf32>
      scf.yield %228, %233 : vector<8x32xf32>, vector<8x32xf32>
    }
    %c4_i32_28 = arith.constant 4 : i32
    %c0_29 = arith.constant 0 : index
    %c0_30 = arith.constant 0 : index
    %27 = vector.load %arg13[%c0_29, %c0_30] : memref<8x32xf32, #tpu.memory_space<vmem>>, vector<8x32xf32>
    tpu.vector_store %arg13[%c0_29, %c0_30], %26#0 {strides = array<i32>} : memref<8x32xf32, #tpu.memory_space<vmem>>, vector<8x32xf32>,
    %c0_31 = arith.constant 0 : index
    %c0_32 = arith.constant 0 : index
    %28 = vector.load %arg14[%c0_31, %c0_32] : memref<8x32xf32, #tpu.memory_space<vmem>>, vector<8x32xf32>
    tpu.vector_store %arg14[%c0_31, %c0_32], %26#1 {strides = array<i32>} : memref<8x32xf32, #tpu.memory_space<vmem>>, vector<8x32xf32>,
    %c0_33 = arith.constant 0 : index
    %c0_34 = arith.constant 0 : index
    %29 = vector.load %arg12[%c0_33, %c0_34] : memref<8x64xf32, #tpu.memory_space<vmem>>, vector<8x32xf32>
    tpu.vector_store %arg12[%c0_33, %c0_34], %26#0 {strides = array<i32>} : memref<8x64xf32, #tpu.memory_space<vmem>>, vector<8x32xf32>,
    %c0_35 = arith.constant 0 : index
    %c32 = arith.constant 32 : index
    %30 = vector.load %arg12[%c0_35, %c32] : memref<8x64xf32, #tpu.memory_space<vmem>>, vector<8x32xf32>
    tpu.vector_store %arg12[%c0_35, %c32], %26#1 {strides = array<i32>} : memref<8x64xf32, #tpu.memory_space<vmem>>, vector<8x32xf32>,
    return
  }
  func.func @transform_0(%arg0: i32) -> (i32, i32) {
    %c0_i32 = arith.constant 0 : i32
    %c0_i32_0 = arith.constant 0 : i32
    %c0_i32_1 = arith.constant 0 : i32
    return %c0_i32, %c0_i32_0 : i32, i32
  }
  func.func @transform_1(%arg0: i32) -> (i32, i32) {
    %c0_i32 = arith.constant 0 : i32
    %c0_i32_0 = arith.constant 0 : i32
    return %arg0, %c0_i32 : i32, i32
  }
  func.func @transform_2(%arg0: i32) -> (i32, i32) {
    %c0_i32 = arith.constant 0 : i32
    %0 = arith.subi %c0_i32, %arg0 : i32
    %c0_i32_0 = arith.constant 0 : i32
    %c0_i32_1 = arith.constant 0 : i32
    return %0, %c0_i32_0 : i32, i32
  }
  func.func @transform_3(%arg0: i32) -> (i32, i32) {
    %c0_i32 = arith.constant 0 : i32
    %c0_i32_0 = arith.constant 0 : i32
    %c0_i32_1 = arith.constant 0 : i32
    return %c0_i32, %c0_i32_0 : i32, i32
  }
  func.func @transform_4(%arg0: i32) -> (i32, i32) {
    %c0_i32 = arith.constant 0 : i32
    %c0_i32_0 = arith.constant 0 : i32
    %c0_i32_1 = arith.constant 0 : i32
    return %c0_i32, %c0_i32_0 : i32, i32
  }
  func.func @transform_5(%arg0: i32) -> (i32, i32) {
    %c0_i32 = arith.constant 0 : i32
    %c0_i32_0 = arith.constant 0 : i32
    %c0_i32_1 = arith.constant 0 : i32
    return %c0_i32, %c0_i32_0 : i32, i32
  }
  func.func @transform_6(%arg0: i32) -> (i32, i32) {
    %c0_i32 = arith.constant 0 : i32
    %c0_i32_0 = arith.constant 0 : i32
    %c0_i32_1 = arith.constant 0 : i32
    return %c0_i32, %c0_i32_0 : i32, i32
  }
  func.func @transform_7(%arg0: i32) -> (i32, i32) {
    %c0_i32 = arith.constant 0 : i32
    %c0_i32_0 = arith.constant 0 : i32
    %c0_i32_1 = arith.constant 0 : i32
    return %c0_i32, %c0_i32_0 : i32, i32
  }
  func.func @transform_8(%arg0: i32) -> (i32, i32) {
    %c0_i32 = arith.constant 0 : i32
    %c0_i32_0 = arith.constant 0 : i32
    %c0_i32_1 = arith.constant 0 : i32
    return %c0_i32, %c0_i32_0 : i32, i32
  }
  func.func @transform_9(%arg0: i32) -> (i32, i32, i32) {
    %c0_i32 = arith.constant 0 : i32
    %c0_i32_0 = arith.constant 0 : i32
    %c0_i32_1 = arith.constant 0 : i32
    return %arg0, %c0_i32, %c0_i32_0 : i32, i32, i32
  }
  func.func @transform_10(%arg0: i32) -> (i32, i32, i32) {
    %c0_i32 = arith.constant 0 : i32
    %0 = arith.subi %c0_i32, %arg0 : i32
    %c0_i32_0 = arith.constant 0 : i32
    %c0_i32_1 = arith.constant 0 : i32
    %c0_i32_2 = arith.constant 0 : i32
    return %0, %c0_i32_0, %c0_i32_1 : i32, i32, i32
  }
  func.func @transform_11(%arg0: i32) -> (i32, i32) {
    %c0_i32 = arith.constant 0 : i32
    %c0_i32_0 = arith.constant 0 : i32
    %c0_i32_1 = arith.constant 0 : i32
    return %c0_i32, %c0_i32_0 : i32, i32
  }
}

</mosaic_0001>

<bundles_post_ra>
// kernel: tpu_custom_call.1
= control target key start
LH: loop header
LB: loop body
LE: loop exit
PB: predicated region body
PF: predicated region fallthrough
CT: control target
= control target key end

     0   :  { %17 = vsyncpa [#allocation7], 0  ;;  %s1545_s0 = inlined_call_operand.vmem [shape: s32[8,1], index: 0, kind: input, shape index: {}]   ;;  %s1546_s1 = inlined_call_operand.vmem [shape: bf16[64,16], index: 1, kind: input, shape index: {}]   ;;  %s1547_s2 = inlined_call_operand.vmem [shape: bf16[64,16], index: 2, kind: input, shape index: {}]   ;;  %s1548_s3 = inlined_call_operand.vmem [shape: bf16[16,96], index: 3, kind: input, shape index: {}]   ;;  %s1549_s4 = inlined_call_operand.vmem [shape: bf16[16,96], index: 4, kind: input, shape index: {}]   ;;  %s1550_s5 = inlined_call_operand.vmem [shape: f32[1,96], index: 5, kind: input, shape index: {}]   ;;  %s1551_s6 = inlined_call_operand.vmem [shape: f32[1,96], index: 6, kind: input, shape index: {}]   ;;  %s1552_s7 = inlined_call_operand.vmem [shape: bf16[64,192], index: 7, kind: input, shape index: {}]   ;;  %s1553_s8 = inlined_call_operand.vmem [shape: f32[1,192], index: 8, kind: input, shape index: {}]   ;;  %s1554_s9 = inlined_call_operand.hbm [shape: f32[8,8,32], index: 9, kind: output, shape index: {0}]   ;;  %s1555_s10 = inlined_call_operand.hbm [shape: f32[8,8,32], index: 10, kind: output, shape index: {1}]   ;;  %s1556_s11 = inlined_call_operand.hbm [shape: f32[8,64], index: 11, kind: output, shape index: {2}]  }
   0x1   :  { %18 = vsyncpa [#allocation9], 0  ;;  %vm66_vm0 = vcmask 261120   ;;  %v1209_v0 = vmov 0.0   ;;  %v1054_v1 = vld [vmem:[%s1548_s3] sm:$0xff]   ;;  %vm112_vm1 = vcmask 130048  }
   0x2   :  { %67 = vst.msk [vmem:[#allocation2] sm:$0xff] %vm66_vm0, %v1209_v0  ;;  %68 = vst.msk [vmem:[#allocation3] sm:$0xff] %vm66_vm0, %v1209_v0  ;;  %v1055_v2 = vld [vmem:[%s1549_s4] sm:$0xff]   ;;  %998 = vmatprep.subr.bf16.mxu0 %v1054_v1  ;;  %v1058_v5 = vld [vmem:[%s1546_s1 + $0x8] sm:$0xff]   ;;  %vm310_vm2 = vcmask 785408  }
   0x3   :  { %v1056_v3 = vld [vmem:[%s1546_s1] sm:$0xff]   ;;  %1008 = vmatprep.subr.bf16.mxu1 %v1055_v2  ;;  %999 = vmatpush3.bf16.msra.mxu0 %v1054_v1  ;;  %v1059_v6 = vld [vmem:[%s1547_s2 + $0x8] sm:$0xff]   ;;  %v1060_v7 = vld [vmem:[%s1546_s1 + $0x10] sm:$0xff]  }
   0x4   :  { %v1057_v4 = vld [vmem:[%s1547_s2] sm:$0xff]   ;;  %1009 = vmatpush3.bf16.msra.mxu1 %v1055_v2  ;;  %1000 = vmatprep.mubr.msk.bf16.mxu0 %vm112_vm1, %v1056_v3  ;;  %v1061_v8 = vld [vmem:[%s1547_s2 + $0x10] sm:$0xff]   ;;  %v1062_v9 = vld [vmem:[%s1546_s1 + $0x18] sm:$0xff]  }
   0x5   :  { %1010 = vmatprep.mubr.msk.bf16.mxu1 %vm112_vm1, %v1057_v4  ;;  %v1063_v10 = vld [vmem:[%s1547_s2 + $0x18] sm:$0xff]   ;;  %v1324_v11 = vld [vmem:[%s1545_s0] sm:$0xff]  ;;  %s1352_s0 = smov 0  }
   0x6   :  { %1001 = vmatmul.mubr.msk.bf16.vlgmr.msra.gmra.mrb[0].mxu0 %vm112_vm1, %v1058_v5  ;;  %v927_v14 = vld [vmem:[%s1550_s5] ss:$0 sm:$0xff] }
   0x7   :  { %1011 = vmatmul.mubr.msk.bf16.vlgmr.msra.gmra.mrb[0].mxu1 %vm112_vm1, %v1059_v6  ;;  %1004 = vmatprep.mubr.msk.bf16.mxu0 %vm112_vm1, %v1060_v7  ;;  %v937_v15 = vld [vmem:[%s1551_s6] ss:$0 sm:$0xff] }
   0x8   :  { %1014 = vmatprep.mubr.msk.bf16.mxu1 %vm112_vm1, %v1061_v8 }
   0x9   :  { %v331_v12 = vld [vmem:[#allocation2] sm:$0xff]   ;;  %v332_v13 = vld [vmem:[#allocation3] sm:$0xff]  }
   0xe   :  { %1005 = vmatmul.mubr.msk.bf16.gmra.mrb[4].mxu0 %vm112_vm1, %v1062_v9 }
   0xf   :  { %1015 = vmatmul.mubr.msk.bf16.gmra.mrb[4].mxu1 %vm112_vm1, %v1063_v10 }
  0xd9   :  { %v1002_v16 = vpop.f32.mrb[0].mxu0 }
  0xda   :  { %v168_v17 = vadd.f32 %v1002_v16, %v927_v14  ;;  %v1012_v18 = vpop.f32.mrb[0].mxu1  ;;  %v159_v19 = vpop.f32.mrb[1].mxu0 }
  0xdb   :  { %v288_v20 = vadd.f32 %v1012_v18, %v937_v15  ;;  %v160_v21 = vadd.f32 %v927_v14, %v159_v19  ;;  %v279_v22 = vpop.f32.mrb[1].mxu1  ;;  %v1003_v23 = vpop.f32.mrb[2].mxu0 }
  0xdc   :  { %313 = vst.msk [vmem:[#allocation4 + $0x10] sm:$0xff] %vm310_vm2, %v168_v17  ;;  %v280_v24 = vadd.f32 %v937_v15, %v279_v22  ;;  %v171_v25 = vadd.f32 %v1003_v23, %v927_v14  ;;  %v1013_v26 = vpop.f32.mrb[2].mxu1  ;;  %v162_v27 = vpop.f32.mrb[3].mxu0 }
  0xdd   :  { %321 = vst.msk [vmem:[#allocation5 + $0x10] sm:$0xff] %vm310_vm2, %v288_v20  ;;  %311 = vst.msk [vmem:[#allocation4] sm:$0xff] %vm310_vm2, %v160_v21  ;;  %v291_v28 = vadd.f32 %v1013_v26, %v937_v15  ;;  %v163_v29 = vadd.f32 %v927_v14, %v162_v27  ;;  %v282_v30 = vpop.f32.mrb[3].mxu1 }
  0xde   :  { %319 = vst.msk [vmem:[#allocation5] sm:$0xff] %vm310_vm2, %v280_v24  ;;  %314 = vst.msk [vmem:[#allocation4 + $0x18] sm:$0xff] %vm310_vm2, %v171_v25  ;;  %v283_v31 = vadd.f32 %v937_v15, %v282_v30 }
  0xdf   :  { %322 = vst.msk [vmem:[#allocation5 + $0x18] sm:$0xff] %vm310_vm2, %v291_v28  ;;  %312 = vst.msk [vmem:[#allocation4 + $0x8] sm:$0xff] %vm310_vm2, %v163_v29 }
  0xe0   :  { %320 = vst.msk [vmem:[#allocation5 + $0x8] sm:$0xff] %vm310_vm2, %v283_v31 }
  0xe1   :  { %v1006_v32 = vpop.f32.mrb[4].mxu0 }
  0xe2   :  { %v184_v33 = vadd.f32 %v1006_v32, %v927_v14  ;;  %v1016_v34 = vpop.f32.mrb[4].mxu1  ;;  %v175_v35 = vpop.f32.mrb[5].mxu0 }
  0xe3   :  { %v304_v36 = vadd.f32 %v1016_v34, %v937_v15  ;;  %v176_v37 = vadd.f32 %v927_v14, %v175_v35  ;;  %v295_v38 = vpop.f32.mrb[5].mxu1  ;;  %v1007_v39 = vpop.f32.mrb[6].mxu0 }
  0xe4   :  { %317 = vst.msk [vmem:[#allocation4 + $0x30] sm:$0xff] %vm310_vm2, %v184_v33  ;;  %v296_v40 = vadd.f32 %v937_v15, %v295_v38  ;;  %v187_v41 = vadd.f32 %v1007_v39, %v927_v14  ;;  %v1017_v42 = vpop.f32.mrb[6].mxu1  ;;  %v178_v43 = vpop.f32.mrb[7].mxu0 }
  0xe5   :  { %325 = vst.msk [vmem:[#allocation5 + $0x30] sm:$0xff] %vm310_vm2, %v304_v36  ;;  %315 = vst.msk [vmem:[#allocation4 + $0x20] sm:$0xff] %vm310_vm2, %v176_v37  ;;  %v307_v44 = vadd.f32 %v1017_v42, %v937_v15  ;;  %v179_v45 = vadd.f32 %v927_v14, %v178_v43  ;;  %v298_v46 = vpop.f32.mrb[7].mxu1 }
  0xe6   :  { %323 = vst.msk [vmem:[#allocation5 + $0x20] sm:$0xff] %vm310_vm2, %v296_v40  ;;  %318 = vst.msk [vmem:[#allocation4 + $0x38] sm:$0xff] %vm310_vm2, %v187_v41  ;;  %v299_v47 = vadd.f32 %v937_v15, %v298_v46 }
  0xe7   :  { %326 = vst.msk [vmem:[#allocation5 + $0x38] sm:$0xff] %vm310_vm2, %v307_v44  ;;  %316 = vst.msk [vmem:[#allocation4 + $0x28] sm:$0xff] %vm310_vm2, %v179_v45 }
  0xe8   :  { %324 = vst.msk [vmem:[#allocation5 + $0x28] sm:$0xff] %vm310_vm2, %v299_v47 }
  0xe9 LB: > { %v1071_v48 = vld [vmem:[%s1552_s7 + $0x4] ss:$8 sps:$4 sm:$0xff]   ;;  %v1073_v49 = vld [vmem:[%s1552_s7] ss:$8 sps:$4 sm:$0xff]   ;;  %v1210_v50 = vmov 0   ;;  %s1211_s22 = smov 32   ;;  %v377_v60 = vlaneseq  ;;  %s1207_s0 = sphi %s1352_s0, %s338_s0   ;;  %v1203_v12 = vphi %v331_v12, %v1558_v12   ;;  %v1199_v13 = vphi %v332_v13, %v1557_v13  }
  0xea   : > { %463 = vmatprep.mubr.bf16.mxu0 %v1210_v50  ;;  %1064 = vset.pattern.permute.xlu1 %v1210_v50  ;;  %v1074_v51 = vld [vmem:[%s1552_s7 + $0x14] ss:$8 sps:$4 sm:$0xff]   ;;  %v1076_v52 = vld [vmem:[%s1552_s7 + $0x10] ss:$8 sps:$4 sm:$0xff]   ;;  %v1077_v53 = vld [vmem:[%s1552_s7 + $0x24] ss:$8 sps:$4 sm:$0xff]  }
  0xeb   : > { %361 = vrot.lane.b32.xlu0 %v1199_v13, %s1211_s22  ;;  %431 = vmatprep.subr.bf16.mxu0 %v1071_v48  ;;  %v1079_v54 = vld [vmem:[%s1552_s7 + $0x20] ss:$8 sps:$4 sm:$0xff]   ;;  %v1080_v55 = vld [vmem:[%s1552_s7 + $0x34] ss:$8 sps:$4 sm:$0xff]   ;;  %v1082_v56 = vld [vmem:[%s1552_s7 + $0x30] ss:$8 sps:$4 sm:$0xff]  }
  0xec   : > { %432 = vmatpush1.bf16.msra.mxu0 %v1073_v49  ;;  %1065 = vset.pattern.permute.xlu0 %v1210_v50  ;;  %vm427_vm3 = vcmask 523264   ;;  %v1395_v61 = vshrl.u32 %v377_v60, 7  ;;  %v375_v63 = vld [vmem:[%s1553_s8] sm:$0x3]  ;;  %s1402_s16 = sshll.u32 %s1207_s0, 1  ;;  %s1212_s17 = smov 64  }
  0xed   : > { %433 = vmatprep.subr.bf16.mxu0 %v1074_v51  ;;  %675 = vmatprep.subr.bf16.mxu1 %v1071_v48  ;;  %v351_v2 = vstv %s1402_s16  ;;  %v1213_v9 = vmov 0.0   ;;  %s1214_s18 = smov 96   ;;  %s985_s19 = sshll.u32 %s1207_s0, 4 }
  0xee   : > { %676 = vmatpush1.bf16.msra.mxu1 %v1073_v49  ;;  %707 = vmatprep.mubr.bf16.mxu1 %v1210_v50  ;;  %v379_v62 = vsub.s32 0, %v1395_v61  ;;  %v383_v1 = vsub.s32 1, %v1395_v61  ;;  %vm352_vm4 = vcmp.lt.s32.totalorder %v351_v2, %v1324_v11  ;;  %s1418_s1 = scalar_lea.vmem [#allocation4], %s985_s19  ;;  %s343_s20 = ssub.s32 7, %s1402_s16 }
  0xef   : > { %677 = vmatprep.subr.bf16.mxu1 %v1074_v51  ;;  %v950_v10 = vsel %vm352_vm4, 1.0, %v1213_v9  ;;  %v346_v16 = vld [vmem:[%s1418_s1] sm:$0xff]  ;;  %s1422_s2 = sshll.u32 %s343_s20, 3  ;;  %v356_v30 = vstv %s343_s20  ;;  %s589_s23 = ssub.s32 6, %s1402_s16 }
  0xf0   : > { %434 = vmatpush1.bf16.msra.mxu0 %v1076_v52  ;;  %v380_v0 = vrot.slane %v375_v63, %v379_v62  ;;  %v384_v5 = vrot.slane %v375_v63, %v383_v1  ;;  %v565_v15 = vsub.f32 1.0, %v950_v10  ;;  %s348_s5 = scalar_lea.vmem [#allocation5], %s1422_s2  ;;  %vm357_vm5 = vcmp.lt.s32.totalorder %v356_v30, %v1324_v11  ;;  %s1466_s24 = sshll.u32 %s589_s23, 3 }
  0xf1   : > { %435 = vmatprep.subr.bf16.mxu0 %v1077_v53  ;;  %v349_v21 = vld [vmem:[%s348_s5] sm:$0xff]  ;;  %v951_v33 = vsel %vm357_vm5, 1.0, %v1213_v9  ;;  %s342_s3 = sadd.s32 1, %s1402_s16  ;;  %s594_s25 = scalar_lea.vmem [#allocation5], %s1466_s24 }
  0xf2   : > { %678 = vmatpush1.bf16.msra.mxu1 %v1076_v52  ;;  %v577_v35 = vsub.f32 1.0, %v951_v33  ;;  %v595_v61 = vld [vmem:[%s594_s25] sm:$0xff]  ;;  %s557_s4 = scalar_lea.vmem [#allocation6], %s985_s19  ;;  %s803_s26 = scalar_lea.vmem [#allocation8], %s1466_s24 }
  0xf3   : > { %679 = vmatprep.subr.bf16.mxu1 %v1077_v53  ;;  %s338_s0 = sadd.s32 1, %s1207_s0  }
  0xf4   : > { %436 = vmatpush1.bf16.msra.mxu0 %v1079_v54  ;;  %p335_p0 = scmp.ge.s32.totalorder %s338_s0, 4  }
  0xf5   : > { %437 = vmatprep.subr.bf16.mxu0 %v1080_v55  ;;  %s1215_s27 = smov (%p335_p0), 32   ;;  %s1216_s28 = smov (%p335_p0), [#allocation8]  }
  0xf6   : > { %680 = vmatpush1.bf16.msra.mxu1 %v1079_v54  ;;  %s860_s29 = sshll.u32 (%p335_p0), %s1216_s28, 4  ;;  %s1217_s30 = smov (%p335_p0), [#allocation6]   ;;  %s861_s29 = int_to_ptr.vmem [resolvable:$true] %s860_s29 }
  0xf7   : > { %681 = vmatprep.subr.bf16.mxu1 %v1080_v55  ;;  %s844_s12 = sshll.u32 (%p335_p0), %s1217_s30, 4  ;;  %s1115_s13 = scalar_lea.vmem (%p335_p0), %s861_s29, 1024  ;;  %s845_s12 = int_to_ptr.vmem [resolvable:$true] %s844_s12 }
  0xf8   : > { %438 = vmatpush1.bf16.msra.mxu0 %v1082_v56  ;;  %p1116_p1 = scmp.ne.s32.totalorder (%p335_p0), %s861_s29, %s1115_s13  ;;  %p1120_p2 = scmp.lt.s32.totalorder (%p335_p0), %s861_s29, %s861_s29 }
  0xf9   :  { %p1121_p3 = scmp.lt.s32.totalorder (%p335_p0), %s1115_s13, %s1115_s13 }
  0xfa   : > { %682 = vmatpush1.bf16.msra.mxu1 %v1082_v56 }
  0xfb   :  { %p1122_p4 = por (%p335_p0), %p1121_p3, %p1120_p2 }
  0xfd   :  { %p1123_p5 = pnand (%p335_p0), %p1122_p4, %p1116_p1 }
 0x15d   : > { %v1389_v57 = vpop.permute.xlu0 %361 }
 0x15e   : > { %v365_v58 = vsel %vm66_vm0, %v1203_v12, %v1389_v57 }
 0x15f   : > { %v366_v59 = vpack.c.bf16 %v365_v58, %v365_v58 }
 0x161   : > { %960 = vmatmul.mubr.msk.bf16.vlgmr.msra.gmra.mrb[0].mxu0 %vm427_vm3, %v366_v59 }
 0x234   : > { %v465_v3 = vpop.f32.mrb[0].mxu0 }
 0x235   : > { %v466_v4 = vadd.f32 %v465_v3, %v380_v0  ;;  %v467_v6 = vpop.f32.mrb[1].mxu0 }
 0x236   : > { %v469_v7 = vpop.f32.mrb[2].mxu0  ;;  %v468_v14 = vadd.f32 %v467_v6, %v384_v5 }
 0x237   : > { %v470_v8 = vpop.f32.mrb[3].mxu0  ;;  %502 = vrot.lane.b32.xlu1 %v466_v4, %s1211_s22  ;;  %480 = vrot.lane.b32.xlu0 %v466_v4, %s1212_s17  ;;  %v472_v17 = vadd.f32 %v466_v4, %v346_v16 }
 0x239   : > { %v961_v18 = vmul.f32 -1.442695, %v472_v17 }
 0x23b   : > { %523 = vrot.lane.b32.xlu1 %v468_v14, %s1214_s18  ;;  %1083 = vpow2.f32 %v961_v18 }
 0x23f   : > { %568 = vperm.xlu1 %1064, %v565_v15  }
 0x243   : > { %543 = vperm.xlu1 %1064, %v950_v10  }
 0x245   : > { %v1084_v19 = vpop.eup %1083 }
 0x246   : > { %v476_v20 = vadd.f32 1.0, %v1084_v19 }
 0x248   : > { %1085 = vrcp.f32 %v476_v20 }
 0x252   : > { %v1086_v22 = vpop.eup %1085 }
 0x253   : > { %v490_v48 = vsub.f32 1.0, %v1086_v22 }
 0x2a9   : > { %v503_v23 = vpop.permute.xlu1 %502  ;;  %v481_v24 = vpop.permute.xlu0 %480 }
 0x2aa   : > { %v505_v25 = vadd.f32 %v503_v23, %v349_v21  ;;  %v483_v26 = vmul.f32 %v1086_v22, %v481_v24  ;;  %v966_v24 = vld [vmem:[%s1418_s1 + $0x8] sm:$0xff] }
 0x2ac   : > { %v962_v27 = vmul.f32 -1.442695, %v505_v25  ;;  %485 = vrot.lane.b32.xlu0 %v483_v26, %s1212_s17 }
 0x2ad   : > { %v524_v32 = vpop.permute.xlu1 %523 }
 0x2ae   : > { %1087 = vpow2.f32 %v962_v27 }
 0x2b8   : > { %v1088_v28 = vpop.eup %1087 }
 0x2b9   : > { %v509_v29 = vadd.f32 1.0, %v1088_v28 }
 0x2bb   : > { %1089 = vrcp.f32 %v509_v29 }
 0x2be   : > { %v569_v36 = vpop.permute.xlu1 %568 }
 0x2bf   : > { %v571_v37 = vmul.f32 %v1203_v12, %v569_v36 }
 0x2c2   : > { %v544_v46 = vpop.permute.xlu1 %543 }
 0x2c5   : > { %v1090_v31 = vpop.eup %1089 }
 0x2c6   : > { %v526_v34 = vmul.f32 %v1090_v31, %v524_v32 }
 0x2c8   : > { %528 = vrot.lane.b32.xlu0 %v526_v34, %s1212_s17 }
 0x2cc   : > { %580 = vperm.xlu0 %1065, %v577_v35  }
 0x2d0   : > { %573 = vrot.lane.b32.xlu0 %v571_v37, %s1211_s22 }
 0x2d4   : > { %549 = vperm.xlu0 %1065, %v951_v33  }
 0x31e   : > { %v486_v38 = vpop.permute.xlu0 %485 }
 0x31f   : > { %v488_v39 = vadd.f32 %v486_v38, %v346_v16  ;;  %v602_v38 = vstv %s589_s23 }
 0x320   : > { %vm603_vm7 = vcmp.lt.s32.totalorder %v602_v38, %v1324_v11 }
 0x321   : > { %1091 = vtanh.f32 %v488_v39 }
 0x32b   : > { %v1092_v40 = vpop.eup %1091 }
 0x32c   : > { %492 = vrot.lane.b32.xlu1 %v1092_v40, %s1214_s18 }
 0x330   : > { %497 = vrot.lane.b32.xlu1 %v1203_v12, %s1211_s22 }
 0x334   : > { %513 = vrot.lane.b32.xlu1 %v468_v14, %s1211_s22 }
 0x33a   : > { %v529_v41 = vpop.permute.xlu0 %528 }
 0x33b   : > { %v531_v42 = vadd.f32 %v529_v41, %v349_v21  ;;  %v969_v41 = vsel %vm603_vm7, 1.0, %v1213_v9 }
 0x33d   : > { %1093 = vtanh.f32 %v531_v42 }
 0x347   : > { %v1094_v43 = vpop.eup %1093 }
 0x348   : > { %535 = vrot.lane.b32.xlu1 %v1094_v43, %s1214_s18 }
 0x34b   : > { %v581_v44 = vpop.permute.xlu0 %580 }
 0x34c   : > { %v583_v45 = vmul.f32 %v1199_v13, %v581_v44  ;;  %v813_v44 = vsub.f32 1.0, %v969_v41 }
 0x34e   : > { %585 = vrot.lane.b32.xlu0 %v583_v45, %s1211_s22 }
 0x34f   : > { %v574_v53 = vpop.permute.xlu0 %573 }
 0x353   : > { %v550_v5 = vpop.permute.xlu0 %549 }
 0x39e   : > { %v493_v47 = vpop.permute.xlu1 %492 }
 0x39f   : > { %v495_v50 = vmul.f32 %v493_v47, %v490_v48 }
 0x3a2   : > { %v498_v49 = vpop.permute.xlu1 %497 }
 0x3a3   : > { %v500_v51 = vmul.f32 %v1086_v22, %v498_v49 }
 0x3a5   : > { %v501_v12 = vadd.f32 %v500_v51, %v495_v50 }
 0x3a6   : > { %v514_v55 = vpop.permute.xlu1 %513 }
 0x3a7   : > { %v1438_v52 = vmul.f32 %v544_v46, %v501_v12  ;;  %v516_v13 = vadd.f32 %v514_v55, %v349_v21 }
 0x3a9   : > { %v1441_v54 = vadd.f32 %v574_v53, %v1438_v52  ;;  %v963_v56 = vmul.f32 -1.442695, %v516_v13 }
 0x3ab   : > { %607 = vrot.lane.b32.xlu1 %v1441_v54, %s1214_s18  ;;  %1095 = vpow2.f32 %v963_v56 }
 0x3b5   : > { %v1096_v58 = vpop.eup %1095 }
 0x3b6   : > { %v520_v59 = vadd.f32 1.0, %v1096_v58 }
 0x3b8   : > { %1097 = vrcp.f32 %v520_v59 }
 0x3ba   : > { %v536_v0 = vpop.permute.xlu1 %535 }
 0x3c0   : > { %v586_v7 = vpop.permute.xlu0 %585 }
 0x3c2   : > { %v1098_v60 = vpop.eup %1097 }
 0x3c3   : > { %v533_v63 = vsub.f32 1.0, %v1098_v60  ;;  %v539_v3 = vmul.f32 %v1098_v60, %v1389_v57  ;;  %v620_v57 = vld [vmem:[%s1553_s8] sm:$0x3] }
 0x3c4   : > { %v625_v16 = vrot.slane %v620_v57, %v379_v62  ;;  %v629_v19 = vrot.slane %v620_v57, %v383_v1  ;;  %v597_v1 = vstv %s342_s3 }
 0x3c5   : > { %v538_v2 = vmul.f32 %v536_v0, %v533_v63  ;;  %vm598_vm6 = vcmp.lt.s32.totalorder %v597_v1, %v1324_v11 }
 0x3c6   : > { %v968_v34 = vsel %vm598_vm6, 1.0, %v1213_v9 }
 0x3c7   : > { %v540_v4 = vadd.f32 %v539_v3, %v538_v2  ;;  %v805_v35 = vsub.f32 1.0, %v968_v34  ;;  %v1066_v43 = vpack.i.bf16 %v969_v41, %v968_v34 }
 0x3c9   : > { %v1446_v6 = vmul.f32 %v550_v5, %v540_v4 }
 0x3cb   : > { %v1449_v8 = vadd.f32 %v586_v7, %v1446_v6 }
 0x41d   : > { %v608_v10 = vpop.permute.xlu1 %607 }
 0x41e   : > { %v610_v14 = vsel %vm66_vm0, %v608_v10, %v1449_v8 }
 0x41f   : > { %v611_v15 = vpack.c.bf16 %v610_v14, %v610_v14 }
 0x421   : > { %978 = vmatmul.mubr.msk.bf16.vlgmr.msra.gmra.mrb[0].mxu1 %vm427_vm3, %v611_v15 }
 0x4f4   : > { %v709_v17 = vpop.f32.mrb[0].mxu1 }
 0x4f5   : > { %v710_v18 = vadd.f32 %v709_v17, %v625_v16  ;;  %v711_v20 = vpop.f32.mrb[1].mxu1 }
 0x4f6   : > { %v713_v21 = vpop.f32.mrb[2].mxu1  ;;  %v712_v23 = vadd.f32 %v711_v20, %v629_v19 }
 0x4f7   : > { %v714_v22 = vpop.f32.mrb[3].mxu1  ;;  %724 = vrot.lane.b32.xlu1 %v710_v18, %s1212_s17  ;;  %742 = vrot.lane.b32.xlu0 %v710_v18, %s1211_s22  ;;  %v716_v25 = vadd.f32 %v966_v24, %v710_v18 }
 0x4f9   : > { %v979_v62 = vmul.f32 -1.442695, %v716_v25 }
 0x4fb   : > { %763 = vrot.lane.b32.xlu0 %v712_v23, %s1214_s18  ;;  %1099 = vpow2.f32 %v979_v62 }
 0x505   : > { %v1100_v26 = vpop.eup %1099 }
 0x506   : > { %v720_v27 = vadd.f32 1.0, %v1100_v26 }
 0x508   : > { %1101 = vrcp.f32 %v720_v27 }
 0x512   : > { %v1102_v28 = vpop.eup %1101 }
 0x513   : > { %v734_v55 = vsub.f32 1.0, %v1102_v28  ;;  %v740_v58 = vmul.f32 %v1102_v28, %v1441_v54 }
 0x569   : > { %v725_v29 = vpop.permute.xlu1 %724  ;;  %v743_v30 = vpop.permute.xlu0 %742 }
 0x56a   : > { %v727_v31 = vmul.f32 %v1102_v28, %v725_v29  ;;  %v745_v32 = vadd.f32 %v743_v30, %v595_v61 }
 0x56c   : > { %v980_v33 = vmul.f32 -1.442695, %v745_v32  ;;  %729 = vrot.lane.b32.xlu1 %v727_v31, %s1212_s17 }
 0x56d   : > { %v764_v40 = vpop.permute.xlu0 %763 }
 0x56e   : > { %1103 = vpow2.f32 %v980_v33 }
 0x570   : > { %753 = vrot.lane.b32.xlu1 %v712_v23, %s1211_s22  ;;  %s563_s22 = scalar_lea.vmem [#allocation8], %s1422_s2 }
 0x574   : > { %808 = vperm.xlu1 %1064, %v805_v35  }
 0x578   : > { %v1104_v36 = vpop.eup %1103 }
 0x579   : > { %v749_v37 = vadd.f32 1.0, %v1104_v36 }
 0x57b   : > { %1105 = vrcp.f32 %v749_v37 }
 0x585   : > { %v1106_v39 = vpop.eup %1105 }
 0x586   : > { %v766_v42 = vmul.f32 %v1106_v39, %v764_v40 }
 0x588   : > { %768 = vrot.lane.b32.xlu0 %v766_v42, %s1212_s17 }
 0x58c   : > { %1067 = vperm.xlu0 %1065, %v1066_v43  }
 0x590   : > { %816 = vperm.xlu0 %1065, %v813_v44  }
 0x5de   : > { %v730_v45 = vpop.permute.xlu1 %729 }
 0x5df   : > { %v732_v46 = vadd.f32 %v966_v24, %v730_v45 }
 0x5e1   : > { %1107 = vtanh.f32 %v732_v46 }
 0x5e2   : > { %v754_v50 = vpop.permute.xlu1 %753 }
 0x5e3   : > { %v756_v51 = vadd.f32 %v754_v50, %v595_v61 }
 0x5e5   : > { %v981_v12 = vmul.f32 -1.442695, %v756_v51 }
 0x5eb   : > { %v1108_v47 = vpop.eup %1107 }
 0x5ec   : > { %736 = vrot.lane.b32.xlu1 %v1108_v47, %s1214_s18 }
 0x5f0   : > { %560 = vrot.lane.b32.xlu1 %v1446_v6, %s1214_s18 }
 0x5f3   : > { %v809_v53 = vpop.permute.xlu1 %808 }
 0x5fa   : > { %v769_v48 = vpop.permute.xlu0 %768 }
 0x5fb   : > { %v771_v49 = vadd.f32 %v769_v48, %v595_v61 }
 0x5fd   : > { %1109 = vtanh.f32 %v771_v49 }
 0x5fe   : > { %1111 = vpow2.f32 %v981_v12 }
 0x607   : > { %v1110_v9 = vpop.eup %1109 }
 0x608   : > { %775 = vrot.lane.b32.xlu0 %v1110_v9, %s1214_s18  ;;  %v1112_v3 = vpop.eup %1111 }
 0x609   : > { %v760_v5 = vadd.f32 1.0, %v1112_v3 }
 0x60b   : > { %v1068_v13 = vpop.permute.xlu0 %1067  ;;  %1113 = vrcp.f32 %v760_v5 }
 0x60c   : > { %554 = vrot.lane.b32.xlu0 %v1438_v52, %s1214_s18  ;;  %v1069_v60 = vunpack.i.l.bf16 %v1068_v13  ;;  %v811_v52 = vmul.f32 %v809_v53, %v1441_v54  ;;  %v1070_v16 = vunpack.i.h.bf16 %v1068_v13 }
 0x60f   : > { %v817_v7 = vpop.permute.xlu0 %816 }
 0x610   : > { %v819_v19 = vmul.f32 %v817_v7, %v1449_v8 }
 0x615   : > { %v1114_v6 = vpop.eup %1113 }
 0x616   : > { %v773_v10 = vsub.f32 1.0, %v1114_v6  ;;  %v779_v57 = vmul.f32 %v1114_v6, %v1449_v8 }
 0x65e   : > { %v737_v56 = vpop.permute.xlu1 %736 }
 0x65f   : > { %v739_v59 = vmul.f32 %v737_v56, %v734_v55 }
 0x661   : > { %v741_v63 = vadd.f32 %v740_v58, %v739_v59 }
 0x662   : > { %v561_v0 = vpop.permute.xlu1 %560 }
 0x663   : > { %564 = vst.msk [vmem:[%s563_s22] sm:$0xff] %vm66_vm0, %v561_v0  ;;  %v786_v2 = vmul.f32 %v1069_v60, %v741_v63 }
 0x665   : > { %794 = vrot.lane.b32.xlu1 %v786_v2, %s1214_s18  ;;  %v812_v4 = vadd.f32 %v811_v52, %v786_v2 }
 0x669   : > { %822 = vrot.lane.b32.xlu1 %v812_v4, %s1214_s18 }
 0x67a   : > { %v776_v14 = vpop.permute.xlu0 %775 }
 0x67b   : > { %v778_v15 = vmul.f32 %v776_v14, %v773_v10 }
 0x67d   : > { %v780_v17 = vadd.f32 %v779_v57, %v778_v15 }
 0x67e   : > { %v555_v18 = vpop.permute.xlu0 %554 }
 0x67f   : > { %558 = vst.msk [vmem:[%s557_s4] sm:$0xff] %vm66_vm0, %v555_v18  ;;  %v792_v54 = vmul.f32 %v1070_v16, %v780_v17 }
 0x681   : > { %800 = vrot.lane.b32.xlu0 %v792_v54, %s1214_s18  ;;  %v820_v20 = vadd.f32 %v819_v19, %v792_v54 }
 0x685   : > { %826 = vrot.lane.b32.xlu0 %v820_v20, %s1214_s18 }
 0x6d7   : > { %v795_v21 = vpop.permute.xlu1 %794 }
 0x6d8   : > { %984 = vst.msk [vmem:[%s557_s4 + $0x8] sm:$0xff] %vm66_vm0, %v795_v21 }
 0x6db   : > { %v823_v22 = vpop.permute.xlu1 %822  }
 0x6dc   : > { %v1558_v12 = vmov %v823_v22  ;;  %830 = vst.msk [vmem:[#allocation2] sm:$0xff] (%p335_p0), %vm66_vm0, %v823_v22  ;;  %832 = vst.msk [vmem:[#allocation10] sm:$0xff] (%p335_p0), %vm66_vm0, %v823_v22 }
 0x6f2   :  { %337 = sbr.rel (!%p335_p0) target bundleno = 233 (0xe9), region = 95 }
 0x6f3   : > { %v801_v23 = vpop.permute.xlu0 %800 }
 0x6f4   : > { %804 = vst.msk [vmem:[%s803_s26] sm:$0xff] %vm66_vm0, %v801_v23 }
 0x6f7   : > { %v827_v24 = vpop.permute.xlu0 %826  }
 0x6f8   : > { %v1557_v13 = vmov %v827_v24  ;;  %831 = vst.msk [vmem:[#allocation3] sm:$0xff] (%p335_p0), %vm66_vm0, %v827_v24  ;;  %834 = vrot.lane.b32.xlu0 (%p335_p0), %v827_v24, %s1215_s27 }
 0x6f9   :  { %1126 = shalt.err (!%p1123_p5)
}
 0x6fa   :  { %s1127_s0 = scalar_lea.hbm %s1555_s10, 1024 }
 0x6fb   :  { %p1128_p6 = scmp.ne.s32.totalorder %s1555_s10, %s1127_s0  ;;  %p1131_p7 = scmp.lt.u32.totalorder %s1127_s0, %s1555_s10 }
 0x6fd   :  { %p1133_p8 = pnand %p1131_p7, %p1128_p6 }
 0x6ff   :  { %1136 = shalt.err (!%p1133_p8)
}
 0x700   :  { %s1218_s18 = smov 128   ;;  %s1219_s19 = smov 8  }
 0x701   :  { %866 = dma.vmem_to_hbm [thread:$0]  %s861_s29, 1024, %s1555_s10, [#allocation9], %s1218_s18, %s1218_s18, %s1219_s19  }
 0x702   :  { %s1137_s2 = scalar_lea.vmem %s845_s12, 1024  ;;  %p1142_p10 = scmp.lt.s32.totalorder %s845_s12, %s845_s12 }
 0x703   :  { %p1138_p9 = scmp.ne.s32.totalorder %s845_s12, %s1137_s2  ;;  %p1143_p11 = scmp.lt.s32.totalorder %s1137_s2, %s1137_s2 }
 0x705   :  { %p1144_p12 = por %p1143_p11, %p1142_p10 }
 0x707   :  { %p1145_p13 = pnand %p1144_p12, %p1138_p9 }
 0x709   :  { %1148 = shalt.err (!%p1145_p13)
}
 0x70a   :  { %s1149_s21 = scalar_lea.hbm %s1554_s9, 1024 }
 0x70b   :  { %p1150_p0 = scmp.ne.s32.totalorder %s1554_s9, %s1149_s21  ;;  %p1153_p1 = scmp.lt.u32.totalorder %s1149_s21, %s1554_s9 }
 0x70d   :  { %p1155_p2 = pnand %p1153_p1, %p1150_p0 }
 0x70f   :  { %1158 = shalt.err (!%p1155_p2)
}
 0x710   :  { %850 = dma.vmem_to_hbm [thread:$0]  %s845_s12, 1024, %s1554_s9, [#allocation7], %s1218_s18, %s1218_s18, %s1219_s19   ;;  %vm837_vm8 = vcmask 523520  }
 0x711   :  { %s1220_s4 = smov [#allocation10]  }
 0x712   :  { %s873_s26 = sshll.u32 %s1220_s4, 4  ;;  %s874_s26 = int_to_ptr.vmem [resolvable:$true] %s873_s26 }
 0x713   :  { %s1159_s27 = scalar_lea.vmem %s874_s26, 128  ;;  %p1164_p4 = scmp.lt.s32.totalorder %s874_s26, %s874_s26 }
 0x714   :  { %p1160_p3 = scmp.ne.s32.totalorder %s874_s26, %s1159_s27  ;;  %p1165_p5 = scmp.lt.s32.totalorder %s1159_s27, %s1159_s27 }
 0x716   :  { %p1166_p6 = por %p1165_p5, %p1164_p4 }
 0x718   :  { %p1167_p7 = pnand %p1166_p6, %p1160_p3 }
 0x76a   :  { %v835_v11 = vpop.permute.xlu0 %834 }
 0x76b   :  { %838 = vst.msk [vmem:[#allocation10] sm:$0xff] %vm837_vm8, %v835_v11 }
 0x76c   :  { %1170 = shalt.err (!%p1167_p7)
}
 0x76d   :  { %s1171_s30 = scalar_lea.hbm %s1556_s11, 128 }
 0x76e   :  { %p1172_p8 = scmp.ne.s32.totalorder %s1556_s11, %s1171_s30  ;;  %p1175_p9 = scmp.lt.u32.totalorder %s1171_s30, %s1556_s11 }
 0x770   :  { %p1177_p10 = pnand %p1175_p9, %p1172_p8 }
 0x772   :  { %1180 = shalt.err (!%p1177_p10)
}
 0x773   :  { %876 = dma.vmem_to_hbm [thread:$0]  %s874_s26, 128, %s1556_s11, [#allocation9]  }
 0x774   :  { %1193 = dma.done.wait [#allocation7], 1024  }
 0x775   :  { %1194 = vsyncadd [#allocation7], 4294966272 }
 0x776   :  { %1195 = dma.done.wait [#allocation9], 1152  }
 0x777   :  { %1196 = vsyncadd [#allocation9], 4294966144 }
 0x778   :  { %886 = vsyncpa [#allocation7], 1 }
 0x779   :  { %887 = vsyncpa [#allocation9], 1 }

</bundles_post_ra>
